<compile_context>
chip_gen: v5e
topology: v5e:2x2
jax: 0.10.0
libtpu: 0.0.40
codegen_flags: <defaults>
</compile_context>

<pallas_src>
import math
import jax
import jax.numpy as jnp
from jax import lax
from jax.experimental import pallas as pl
from jax.experimental.pallas import tpu as pltpu


def _gelu_exact(x):
    # PyTorch nn.GELU() default = exact erf-based GELU.
    return 0.5 * x * (1.0 + lax.erf(x * (1.0 / math.sqrt(2.0))))


def _round_up(x, m):
    return ((x + m - 1) // m) * m


def _tpu_generation():
    try:
        kind = jax.devices()[0].device_kind.lower()
    except Exception:
        return "unknown"
    if "v7" in kind:
        return "v7x"
    if "v6" in kind:
        return "v6e"
    if "v5e" in kind or "v5 lite" in kind or "v5litepod" in kind:
        return "v5e"
    return "unknown"


def _tile_config(gen):
    # (tm, th, feature alignment, vmem_limit_bytes)
    if gen == "v5e":
        # 197 TF/s vs ~0.82 TB/s -> tm~256 is compute-bound; 128 MiB VMEM.
        return 256, 1024, 128, 100 * 1024 * 1024
    if gen == "v6e":
        # 918 TF/s vs ~1.4 TB/s -> needs tm~512+; 128 MiB VMEM, 2x256 MXU.
        return 512, 1024, 256, 100 * 1024 * 1024
    if gen == "v7x":
        # ~1 PF/s vs ~3.2 TB/s -> tm 384-512; only 64 MiB VMEM -> ~54 MiB cap.
        return 512, 512, 256, 54 * 1024 * 1024
    # Unknown chip: conservative tiles and VMEM budget.
    return 256, 512, 128, 48 * 1024 * 1024


def _vmem_estimate(tm, th, dp):
    """Rough double-buffered VMEM footprint in bytes."""
    x_bf16 = 2 * tm * dp * 2          # bf16 x tile
    x_f32 = 2 * tm * dp * 4           # f32 residual tile
    w1 = 2 * dp * th * 2              # bf16 W1 slab
    w2 = 2 * th * dp * 2              # bf16 W2 slab
    out = 2 * tm * dp * 4             # f32 output/accumulator tile
    biases = 2 * (th + dp) * 4
    h_tmp = tm * th * 6               # f32 + bf16 h temporaries
    return x_bf16 + x_f32 + w1 + w2 + out + biases + h_tmp


def ffn_kernel(xb_ref, xr_ref, w1_ref, b1_ref, w2_ref, b2_ref, o_ref):
    """Grid = (token_tiles, hidden_tiles); hidden axis is the reduction.

    The output block index (i, 0) is constant across the hidden axis, so the
    f32 output block itself is the accumulator (no scratch, no final copy).
    """
    k = pl.program_id(1)

    @pl.when(k == 0)
    def _():
        o_ref[...] = jnp.zeros_like(o_ref)

    # First linear on a (dp, th) slab of W1: bf16 operands, f32 accumulation.
    h = jnp.dot(xb_ref[...], w1_ref[...], preferred_element_type=jnp.float32)
    h = _gelu_exact(h + b1_ref[...])          # exact erf GELU in f32

    # Second linear: accumulate the (tm, dp) partial product into the output.
    o_ref[...] += jnp.dot(h.astype(jnp.bfloat16), w2_ref[...],
                          preferred_element_type=jnp.float32)

    # Finalize once per token tile: bias-2 + f32 residual.
    @pl.when(k == pl.num_programs(1) - 1)
    def _():
        o_ref[...] = o_ref[...] + b2_ref[...] + xr_ref[...]


def feed_forward(x_tokens, w1, b1, w2, b2, *, tm=None, th=None):
    """x_tokens: [M, dim]. w1: [dim, H], b1: [H], w2: [H, dim], b2: [dim].
    Weights are stored [in, out] (transposed vs PyTorch's [out, in])."""
    M, dim = x_tokens.shape
    H = w1.shape[1]

    gen = _tpu_generation()
    tm_def, th_def, align, vmem_limit = _tile_config(gen)
    if tm is None:
        tm = tm_def
    if th is None:
        th = th_def

    # Pad to TPU-friendly shapes: lane dim multiple of `align` (128/256),
    # token dim multiple of 8 (sublane), hidden dim multiple of th.
    dp = _round_up(dim, align)
    tm = max(8, min(tm, _round_up(M, 8)))      # don't over-pad tiny M
    th = min(th, _round_up(H, align))

    # Shrink tiles until the double-buffered working set fits the VMEM budget
    # (critical on v7x's 64 MiB VMEM).  Shrink th first to preserve weight
    # reuse (~tm FLOP per weight byte).
    budget = int(0.85 * vmem_limit)
    while _vmem_estimate(tm, th, dp) > budget:
        if th > align:
            th = max(align, th // 2)
        elif tm > 128:
            tm = max(128, tm // 2)
        else:
            break

    Mp = _round_up(M, tm)
    Hp = _round_up(H, th)

    x_f32 = jnp.pad(x_tokens.astype(jnp.float32), ((0, Mp - M), (0, dp - dim)))
    x_bf16 = x_f32.astype(jnp.bfloat16)        # pre-cast once (not per k step)
    w1_p = jnp.pad(w1, ((0, dp - dim), (0, Hp - H))).astype(jnp.bfloat16)
    b1_p = jnp.pad(b1, (0, Hp - H)).reshape(1, Hp).astype(jnp.float32)
    w2_p = jnp.pad(w2, ((0, Hp - H), (0, dp - dim))).astype(jnp.bfloat16)
    b2_p = jnp.pad(b2, (0, dp - dim)).reshape(1, dp).astype(jnp.float32)

    out_p = pl.pallas_call(
        ffn_kernel,
        out_shape=jax.ShapeDtypeStruct((Mp, dp), jnp.float32),
        grid_spec=pltpu.PrefetchScalarGridSpec(
            num_scalar_prefetch=0,
            grid=(Mp // tm, Hp // th),                       # reduction axis last
            in_specs=[
                pl.BlockSpec((tm, dp), lambda i, k: (i, 0)),   # x bf16 (matmul)
                pl.BlockSpec((tm, dp), lambda i, k: (i, 0)),   # x f32 (residual)
                pl.BlockSpec((dp, th), lambda i, k: (0, k)),   # W1 slab (bf16)
                pl.BlockSpec((1, th), lambda i, k: (0, k)),    # b1 slab
                pl.BlockSpec((th, dp), lambda i, k: (k, 0)),   # W2 slab (bf16)
                pl.BlockSpec((1, dp), lambda i, k: (0, 0)),    # b2 (tiny, resident)
            ],
            out_specs=pl.BlockSpec((tm, dp), lambda i, k: (i, 0)),
        ),
        compiler_params=pltpu.CompilerParams(
            dimension_semantics=("parallel", "arbitrary"),
            vmem_limit_bytes=vmem_limit,
        ),
    )(x_bf16, x_f32, w1_p, b1_p, w2_p, b2_p)

    return out_p[:M, :dim].astype(x_tokens.dtype)


def init_params(key, dim, mult=4):
    """Deterministic init matching nn.Linear default U(-1/sqrt(in), 1/sqrt(in))."""
    hidden = dim * mult * 2
    k1, k2, k3, k4 = jax.random.split(key, 4)
    bound1 = 1.0 / math.sqrt(dim)
    bound2 = 1.0 / math.sqrt(hidden)
    w1 = jax.random.uniform(k1, (dim, hidden), jnp.float32, -bound1, bound1)
    b1 = jax.random.uniform(k2, (hidden,), jnp.float32, -bound1, bound1)
    w2 = jax.random.uniform(k3, (hidden, dim), jnp.float32, -bound2, bound2)
    b2 = jax.random.uniform(k4, (dim,), jnp.float32, -bound2, bound2)
    return w1, b1, w2, b2


def feed_forward_ref(x_tokens, w1, b1, w2, b2):
    h = x_tokens @ w1 + b1
    h = _gelu_exact(h)
    return h @ w2 + b2 + x_tokens


if __name__ == "__main__":
    batch, seq, dim, mult = 2, 8, 32, 4   # hidden = 256
    key = jax.random.PRNGKey(0)
    kx, kp = jax.random.split(key)

    x = jax.random.normal(kx, (batch, seq, dim), jnp.float32)
    w1, b1, w2, b2 = init_params(kp, dim, mult)

    x_tokens = x.reshape(batch * seq, dim)
    out_tokens = feed_forward(x_tokens, w1, b1, w2, b2)
    out = out_tokens.reshape(batch, seq, dim)
    jax.block_until_ready(out)

    # f32 module reference; kernel uses bf16 matmul operands (f32 accumulation,
    # f32 residual/biases), so compare with a bf16-appropriate tolerance.
    ref = feed_forward_ref(x_tokens, w1, b1, w2, b2).reshape(batch, seq, dim)
    assert jnp.allclose(out, ref, atol=5e-2, rtol=5e-2), "mismatch vs JAX reference"

    print("KERNEL_OK")
</pallas_src>

<mosaic_0001>
module attributes {stable_mosaic.version = 11 : i64} {
  func.func @ffn_kernel(%arg0: i32, %arg1: i32, %arg2: memref<16x128xbf16, #tpu.memory_space<vmem>>, %arg3: memref<16x128xf32, #tpu.memory_space<vmem>>, %arg4: memref<128x256xbf16, #tpu.memory_space<vmem>>, %arg5: memref<1x256xf32, #tpu.memory_space<vmem>>, %arg6: memref<256x128xbf16, #tpu.memory_space<vmem>>, %arg7: memref<1x128xf32, #tpu.memory_space<vmem>>, %arg8: memref<16x128xf32, #tpu.memory_space<vmem>>) attributes {dimension_semantics = [#tpu.dimension_semantics<parallel>, #tpu.dimension_semantics<arbitrary>], iteration_bounds = array<i64: 1, 1>, scalar_prefetch = 0 : i64, scratch_operands = 0 : i64, tpu.core_type = #tpu.core_type<tc>, window_params = [{transform_indices = @transform_0, window_bounds = array<i64: 16, 128>}, {transform_indices = @transform_1, window_bounds = array<i64: 16, 128>}, {transform_indices = @transform_2, window_bounds = array<i64: 128, 256>}, {transform_indices = @transform_3, window_bounds = array<i64: 1, 256>}, {transform_indices = @transform_4, window_bounds = array<i64: 256, 128>}, {pipeline_mode = #tpu.pipeline_mode<synchronous>, transform_indices = @transform_5, window_bounds = array<i64: 1, 128>}, {transform_indices = @transform_6, window_bounds = array<i64: 16, 128>}]} {
    %c0_i32 = arith.constant 0 : i32
    %0 = arith.cmpi eq, %arg1, %c0_i32 : i32
    %1 = arith.extui %0 : i1 to i32
    %c0_i32_0 = arith.constant 0 : i32
    %2 = arith.cmpi ne, %1, %c0_i32_0 : i32
    scf.if %2 {
      %cst_18 = arith.constant 0.000000e+00 : f32
      %26 = vector.broadcast %cst_18 : f32 to vector<16x128xf32>
      %c0_19 = arith.constant 0 : index
      %c0_20 = arith.constant 0 : index
      %27 = vector.load %arg8[%c0_19, %c0_20] : memref<16x128xf32, #tpu.memory_space<vmem>>, vector<16x128xf32>
      tpu.vector_store %arg8[%c0_19, %c0_20], %26 {strides = array<i32>} : memref<16x128xf32, #tpu.memory_space<vmem>>, vector<16x128xf32>,
    } else {
    }
    %c0 = arith.constant 0 : index
    %c0_1 = arith.constant 0 : index
    %3 = vector.load %arg2[%c0, %c0_1] : memref<16x128xbf16, #tpu.memory_space<vmem>>, vector<16x128xbf16>
    %c0_2 = arith.constant 0 : index
    %c0_3 = arith.constant 0 : index
    %4 = vector.load %arg4[%c0_2, %c0_3] : memref<128x256xbf16, #tpu.memory_space<vmem>>, vector<128x256xbf16>
    %cst = arith.constant dense<0.000000e+00> : vector<16x256xf32>
    %5 = tpu.matmul %3, %4, %cst {dimension_numbers = #tpu.dot_dimension_numbers<[1], [0], [0], [1], [0, 0, 1, 1], [], []>} : vector<16x128xbf16>, vector<128x256xbf16>, vector<16x256xf32> -> vector<16x256xf32>
    %c0_4 = arith.constant 0 : index
    %c0_5 = arith.constant 0 : index
    %6 = vector.load %arg5[%c0_4, %c0_5] : memref<1x256xf32, #tpu.memory_space<vmem>>, vector<1x256xf32>
    %7 = vector.broadcast %6 : vector<1x256xf32> to vector<16x256xf32>
    %8 = arith.addf %5, %7 : vector<16x256xf32>
    %cst_6 = arith.constant 5.000000e-01 : f32
    %9 = vector.broadcast %cst_6 : f32 to vector<16x256xf32>
    %10 = arith.mulf %9, %8 : vector<16x256xf32>
    %cst_7 = arith.constant 0.707106769 : f32
    %11 = vector.broadcast %cst_7 : f32 to vector<16x256xf32>
    %12 = arith.mulf %8, %11 : vector<16x256xf32>
    %13 = math.erf %12 : vector<16x256xf32>
    %cst_8 = arith.constant 1.000000e+00 : f32
    %14 = vector.broadcast %cst_8 : f32 to vector<16x256xf32>
    %15 = arith.addf %14, %13 : vector<16x256xf32>
    %16 = arith.mulf %10, %15 : vector<16x256xf32>
    %c0_9 = arith.constant 0 : index
    %c0_10 = arith.constant 0 : index
    %17 = vector.load %arg8[%c0_9, %c0_10] : memref<16x128xf32, #tpu.memory_space<vmem>>, vector<16x128xf32>
    %18 = arith.truncf %16 : vector<16x256xf32> to vector<16x256xbf16>
    %c0_11 = arith.constant 0 : index
    %c0_12 = arith.constant 0 : index
    %19 = vector.load %arg6[%c0_11, %c0_12] : memref<256x128xbf16, #tpu.memory_space<vmem>>, vector<256x128xbf16>
    %cst_13 = arith.constant dense<0.000000e+00> : vector<16x128xf32>
    %20 = tpu.matmul %18, %19, %cst_13 {dimension_numbers = #tpu.dot_dimension_numbers<[1], [0], [0], [1], [0, 0, 1, 1], [], []>} : vector<16x256xbf16>, vector<256x128xbf16>, vector<16x128xf32> -> vector<16x128xf32>
    %21 = arith.addf %17, %20 : vector<16x128xf32>
    %c0_14 = arith.constant 0 : index
    %c0_15 = arith.constant 0 : index
    %22 = vector.load %arg8[%c0_14, %c0_15] : memref<16x128xf32, #tpu.memory_space<vmem>>, vector<16x128xf32>
    tpu.vector_store %arg8[%c0_14, %c0_15], %21 {strides = array<i32>} : memref<16x128xf32, #tpu.memory_space<vmem>>, vector<16x128xf32>,
    %c0_i32_16 = arith.constant 0 : i32
    %23 = arith.cmpi eq, %arg1, %c0_i32_16 : i32
    %24 = arith.extui %23 : i1 to i32
    %c0_i32_17 = arith.constant 0 : i32
    %25 = arith.cmpi ne, %24, %c0_i32_17 : i32
    scf.if %25 {
      %c0_18 = arith.constant 0 : index
      %c0_19 = arith.constant 0 : index
      %26 = vector.load %arg8[%c0_18, %c0_19] : memref<16x128xf32, #tpu.memory_space<vmem>>, vector<16x128xf32>
      %c0_20 = arith.constant 0 : index
      %c0_21 = arith.constant 0 : index
      %27 = vector.load %arg7[%c0_20, %c0_21] : memref<1x128xf32, #tpu.memory_space<vmem>>, vector<1x128xf32>
      %28 = vector.broadcast %27 : vector<1x128xf32> to vector<16x128xf32>
      %29 = arith.addf %26, %28 : vector<16x128xf32>
      %c0_22 = arith.constant 0 : index
      %c0_23 = arith.constant 0 : index
      %30 = vector.load %arg3[%c0_22, %c0_23] : memref<16x128xf32, #tpu.memory_space<vmem>>, vector<16x128xf32>
      %31 = arith.addf %29, %30 : vector<16x128xf32>
      %c0_24 = arith.constant 0 : index
      %c0_25 = arith.constant 0 : index
      %32 = vector.load %arg8[%c0_24, %c0_25] : memref<16x128xf32, #tpu.memory_space<vmem>>, vector<16x128xf32>
      tpu.vector_store %arg8[%c0_24, %c0_25], %31 {strides = array<i32>} : memref<16x128xf32, #tpu.memory_space<vmem>>, vector<16x128xf32>,
    } else {
    }
    return
  }
  func.func @transform_0(%arg0: i32, %arg1: i32) -> (i32, i32) {
    %c0_i32 = arith.constant 0 : i32
    %c0_i32_0 = arith.constant 0 : i32
    return %arg0, %c0_i32 : i32, i32
  }
  func.func @transform_1(%arg0: i32, %arg1: i32) -> (i32, i32) {
    %c0_i32 = arith.constant 0 : i32
    %c0_i32_0 = arith.constant 0 : i32
    return %arg0, %c0_i32 : i32, i32
  }
  func.func @transform_2(%arg0: i32, %arg1: i32) -> (i32, i32) {
    %c0_i32 = arith.constant 0 : i32
    %c0_i32_0 = arith.constant 0 : i32
    return %c0_i32, %arg1 : i32, i32
  }
  func.func @transform_3(%arg0: i32, %arg1: i32) -> (i32, i32) {
    %c0_i32 = arith.constant 0 : i32
    %c0_i32_0 = arith.constant 0 : i32
    return %c0_i32, %arg1 : i32, i32
  }
  func.func @transform_4(%arg0: i32, %arg1: i32) -> (i32, i32) {
    %c0_i32 = arith.constant 0 : i32
    %c0_i32_0 = arith.constant 0 : i32
    return %arg1, %c0_i32 : i32, i32
  }
  func.func @transform_5(%arg0: i32, %arg1: i32) -> (i32, i32) {
    %c0_i32 = arith.constant 0 : i32
    %c0_i32_0 = arith.constant 0 : i32
    %c0_i32_1 = arith.constant 0 : i32
    return %c0_i32, %c0_i32_0 : i32, i32
  }
  func.func @transform_6(%arg0: i32, %arg1: i32) -> (i32, i32) {
    %c0_i32 = arith.constant 0 : i32
    %c0_i32_0 = arith.constant 0 : i32
    return %arg0, %c0_i32 : i32, i32
  }
}

</mosaic_0001>

<bundles_post_ra>
// kernel: tpu_custom_call.1
= control target key start
LH: loop header
LB: loop body
LE: loop exit
PB: predicated region body
PF: predicated region fallthrough
CT: control target
= control target key end

     0   :  { %11 = vsyncpa [#allocation3], 0  ;;  %s1090_s0 = inlined_call_operand.hbm [shape: bf16[16,128], index: 0, kind: input, shape index: {}]   ;;  %s1091_s1 = inlined_call_operand.hbm [shape: f32[16,128], index: 1, kind: input, shape index: {}]   ;;  %s1092_s2 = inlined_call_operand.hbm [shape: bf16[128,256], index: 2, kind: input, shape index: {}]   ;;  %s1093_s3 = inlined_call_operand.vmem [shape: f32[1,256], index: 3, kind: input, shape index: {}]   ;;  %s1094_s4 = inlined_call_operand.hbm [shape: bf16[256,128], index: 4, kind: input, shape index: {}]   ;;  %s1095_s5 = inlined_call_operand.vmem [shape: f32[1,128], index: 5, kind: input, shape index: {}]   ;;  %s1096_s6 = inlined_call_operand.hbm [shape: f32[16,128], index: 6, kind: output, shape index: {}]  }
   0x1   :  { %12 = vsyncpa [#allocation6], 0 }
   0x2   :  { %13 = vsyncpa [#allocation9], 0  ;;  %s32_s23 = sshll.u32 %s1091_s1, 4  ;;  %s33_s23 = int_to_ptr.hbm [resolvable:$true] %s32_s23 }
   0x3   :  { %14 = vsyncpa [#allocation4], 0  ;;  %s925_s24 = smov [#allocation5]   ;;  %s19_s28 = sshll.u32 %s1090_s0, 4  ;;  %s20_s28 = int_to_ptr.hbm [resolvable:$true] %s19_s28 }
   0x4   :  { %s34_s25 = sshll.u32 %s925_s24, 4  ;;  %s926_s29 = smov 128   ;;  %s35_s25 = int_to_ptr.vmem [resolvable:$true] %s34_s25 }
   0x5   :  { %s927_s30 = smov 8   ;;  %s928_s7 = smov [#allocation2]  }
   0x6   :  { %40 = dma.hbm_to_vmem [thread:$0]  %s33_s23, 256, %s35_s25, [#allocation6], %s926_s29, %s926_s29, %s927_s30  }
   0x7   :  { %s21_s8 = sshll.u32 %s928_s7, 4  ;;  %s929_s1 = smov 64   ;;  %s22_s8 = int_to_ptr.vmem [resolvable:$true] %s21_s8 }
   0x8   :  { %s930_s9 = smov 4   ;;  %s45_s12 = sshll.u32 %s1092_s2, 4  ;;  %s46_s12 = int_to_ptr.hbm [resolvable:$true] %s45_s12 }
   0x9   :  { %27 = dma.hbm_to_vmem [thread:$0]  %s20_s28, 128, %s22_s8, [#allocation3], %s929_s1, %s929_s1, %s930_s9  }
   0xa   :  { %s931_s13 = smov [#allocation7]   ;;  %s60_s16 = sshll.u32 %s1094_s4, 4  ;;  %s61_s16 = int_to_ptr.hbm [resolvable:$true] %s60_s16 }
   0xb   :  { %s47_s0 = sshll.u32 %s931_s13, 4  ;;  %s932_s17 = smov [#allocation8]   ;;  %s48_s0 = int_to_ptr.vmem [resolvable:$true] %s47_s0 }
   0xc   :  { %53 = dma.hbm_to_vmem [thread:$0]  %s46_s12, 2048, %s48_s0, [#allocation6], %s926_s29, %s926_s29, %s927_s30  }
   0xd   :  { %s62_s18 = sshll.u32 %s932_s17, 4  ;;  %s63_s18 = int_to_ptr.vmem [resolvable:$true] %s62_s18 }
   0xe   :  { %68 = dma.hbm_to_vmem [thread:$0]  %s61_s16, 2048, %s63_s18, [#allocation9], %s929_s1, %s929_s1, %s930_s9  }
   0xf   :  { %917 = dma.done.wait [#allocation3], 128  }
  0x10   :  { %918 = vsyncadd [#allocation3], 4294967168 }
  0x11   :  { %919 = dma.done.wait [#allocation6], 2304  }
  0x12   :  { %920 = vsyncadd [#allocation6], 4294964992 }
  0x13   :  { %921 = dma.done.wait [#allocation9], 2048  }
  0x14   :  { %922 = vsyncadd [#allocation9], 4294965248  ;;  %v671_v0 = vld [vmem:[#allocation7 + $0x70] sm:$0xf]  ;;  %v761_v1 = vld [vmem:[#allocation7 + $0x74] sm:$0xf0] }
  0x15   :  { %v760_v2 = vld [vmem:[#allocation7 + $0x74] sm:$0xf]  ;;  %v672_v3 = vor.u32 %v761_v1, %v671_v0  ;;  %v673_v4 = vld [vmem:[#allocation7 + $0x78] sm:$0xf0]  ;;  %v663_v5 = vld [vmem:[#allocation7 + $0x60] sm:$0xf] }
  0x16   :  { %v759_v6 = vld [vmem:[#allocation7 + $0x64] sm:$0xf0]  ;;  %v676_v7 = vor.u32 %v760_v2, %v673_v4  ;;  %v758_v8 = vld [vmem:[#allocation7 + $0x64] sm:$0xf]  ;;  %v665_v9 = vld [vmem:[#allocation7 + $0x68] sm:$0xf0] }
  0x17   :  { %203 = vmatpush.bf16.msra.mxu0 %v672_v3  ;;  %v664_v10 = vor.u32 %v759_v6, %v663_v5  ;;  %v668_v11 = vor.u32 %v758_v8, %v665_v9  ;;  %v655_v12 = vld [vmem:[#allocation7 + $0x50] sm:$0xf]  ;;  %v757_v13 = vld [vmem:[#allocation7 + $0x54] sm:$0xf0]  ;;  %v756_v14 = vld [vmem:[#allocation7 + $0x54] sm:$0xf] }
  0x18   :  { %217 = vmatpush.bf16.msra.mxu1 %v676_v7  ;;  %v657_v15 = vld [vmem:[#allocation7 + $0x58] sm:$0xf0]  ;;  %v656_v16 = vor.u32 %v757_v13, %v655_v12  ;;  %v647_v18 = vld [vmem:[#allocation7 + $0x40] sm:$0xf]  ;;  %v755_v19 = vld [vmem:[#allocation7 + $0x44] sm:$0xf0] }
  0x19   :  { %v660_v17 = vor.u32 %v756_v14, %v657_v15  ;;  %v754_v20 = vld [vmem:[#allocation7 + $0x44] sm:$0xf]  ;;  %v649_v21 = vld [vmem:[#allocation7 + $0x48] sm:$0xf0]  ;;  %v648_v22 = vor.u32 %v755_v19, %v647_v18  ;;  %v639_v24 = vld [vmem:[#allocation7 + $0x30] sm:$0xf] }
  0x1a   :  { %v652_v23 = vor.u32 %v754_v20, %v649_v21  ;;  %v753_v25 = vld [vmem:[#allocation7 + $0x34] sm:$0xf0]  ;;  %v752_v26 = vld [vmem:[#allocation7 + $0x34] sm:$0xf]  ;;  %v641_v27 = vld [vmem:[#allocation7 + $0x38] sm:$0xf0] }
  0x1b   :  { %204 = vmatpush.bf16.msra.mxu0 %v664_v10  ;;  %v640_v28 = vor.u32 %v753_v25, %v639_v24  ;;  %v644_v29 = vor.u32 %v752_v26, %v641_v27  ;;  %v631_v30 = vld [vmem:[#allocation7 + $0x20] sm:$0xf]  ;;  %v751_v31 = vld [vmem:[#allocation7 + $0x24] sm:$0xf0]  ;;  %v750_v32 = vld [vmem:[#allocation7 + $0x24] sm:$0xf] }
  0x1c   :  { %218 = vmatpush.bf16.msra.mxu1 %v668_v11  ;;  %v633_v33 = vld [vmem:[#allocation7 + $0x28] sm:$0xf0]  ;;  %v632_v34 = vor.u32 %v751_v31, %v631_v30  ;;  %v623_v36 = vld [vmem:[#allocation7 + $0x10] sm:$0xf]  ;;  %v749_v37 = vld [vmem:[#allocation7 + $0x14] sm:$0xf0] }
  0x1d   :  { %v636_v35 = vor.u32 %v750_v32, %v633_v33  ;;  %v748_v38 = vld [vmem:[#allocation7 + $0x14] sm:$0xf]  ;;  %v625_v39 = vld [vmem:[#allocation7 + $0x18] sm:$0xf0]  ;;  %v624_v40 = vor.u32 %v749_v37, %v623_v36  ;;  %v615_v42 = vld [vmem:[#allocation7] sm:$0xf] }
  0x1e   :  { %v628_v41 = vor.u32 %v748_v38, %v625_v39  ;;  %v747_v43 = vld [vmem:[#allocation7 + $0x4] sm:$0xf0]  ;;  %v746_v44 = vld [vmem:[#allocation7 + $0x4] sm:$0xf]  ;;  %v617_v45 = vld [vmem:[#allocation7 + $0x8] sm:$0xf0] }
  0x1f   :  { %205 = vmatpush.bf16.msra.mxu0 %v656_v16  ;;  %v616_v46 = vor.u32 %v747_v43, %v615_v42  ;;  %v620_v47 = vor.u32 %v746_v44, %v617_v45  ;;  %v745_v48 = vld [vmem:[#allocation2] sm:$0xff]  ;;  %v769_v53 = vld [vmem:[#allocation8 + $0x38] sm:$0xff]  ;;  %v768_v60 = vld [vmem:[#allocation8 + $0x30] sm:$0xff]  ;;  %s933_s20 = smov [#allocation10]   ;;  %s594_s24 = sshll.u32 %s1096_s6, 4  ;;  %s595_s24 = int_to_ptr.hbm [resolvable:$true] %s594_s24 }
  0x20   :  { %219 = vmatpush.bf16.msra.mxu1 %v660_v17  ;;  %v111_v49 = vld [vmem:[%s1093_s3] sm:$0x3]  ;;  %v777_v54 = vld [vmem:[#allocation8 + $0x78] sm:$0xff]  ;;  %539 = vmatpush.bf16.msra.mxu2 %v769_v53  ;;  %v776_v61 = vld [vmem:[#allocation8 + $0x70] sm:$0xff]  ;;  %s592_s21 = sshll.u32 %s933_s20, 4  ;;  %s593_s21 = int_to_ptr.vmem [resolvable:$true] %s592_s21 }
  0x21   :  { %v113_v50 = vperm.slane %v111_v49, 0  ;;  %v114_v51 = vperm.slane %v111_v49, 1  ;;  %553 = vmatpush.bf16.msra.mxu3 %v777_v54  ;;  %v767_v0 = vld [vmem:[#allocation8 + $0x28] sm:$0xff]  ;;  %v766_v8 = vld [vmem:[#allocation8 + $0x20] sm:$0xff]  ;;  %v765_v24 = vld [vmem:[#allocation8 + $0x18] sm:$0xff] }
  0x22   :  { %v775_v1 = vld [vmem:[#allocation8 + $0x68] sm:$0xff]  ;;  %v774_v9 = vld [vmem:[#allocation8 + $0x60] sm:$0xff]  ;;  %v773_v25 = vld [vmem:[#allocation8 + $0x58] sm:$0xff] }
  0x23   :  { %206 = vmatpush.bf16.msra.mxu0 %v648_v22  ;;  %v764_v32 = vld [vmem:[#allocation8 + $0x10] sm:$0xff]  ;;  %v771_v53 = vld [vmem:[#allocation8 + $0x48] sm:$0xff] }
  0x24   :  { %220 = vmatpush.bf16.msra.mxu1 %v652_v23  ;;  %540 = vmatpush.bf16.msra.mxu2 %v768_v60  ;;  %v772_v33 = vld [vmem:[#allocation8 + $0x50] sm:$0xff] }
  0x25   :  { %554 = vmatpush.bf16.msra.mxu3 %v776_v61 }
  0x27   :  { %207 = vmatpush.bf16.msra.mxu0 %v640_v28 }
  0x28   :  { %221 = vmatpush.bf16.msra.mxu1 %v644_v29  ;;  %541 = vmatpush.bf16.msra.mxu2 %v767_v0 }
  0x29   :  { %555 = vmatpush.bf16.msra.mxu3 %v775_v1 }
  0x2b   :  { %208 = vmatpush.bf16.msra.mxu0 %v632_v34 }
  0x2c   :  { %222 = vmatpush.bf16.msra.mxu1 %v636_v35  ;;  %542 = vmatpush.bf16.msra.mxu2 %v766_v8 }
  0x2d   :  { %556 = vmatpush.bf16.msra.mxu3 %v774_v9  ;;  %v762_v9 = vld [vmem:[#allocation8] sm:$0xff] }
  0x2f   :  { %209 = vmatpush.bf16.msra.mxu0 %v624_v40 }
  0x30   :  { %223 = vmatpush.bf16.msra.mxu1 %v628_v41  ;;  %543 = vmatpush.bf16.msra.mxu2 %v765_v24 }
  0x31   :  { %557 = vmatpush.bf16.msra.mxu3 %v773_v25 }
  0x33   :  { %210 = vmatpush.bf16.msra.mxu0 %v616_v46 }
  0x34   :  { %224 = vmatpush.bf16.msra.mxu1 %v620_v47  ;;  %544 = vmatpush.bf16.msra.mxu2 %v764_v32 }
  0x35   :  { %558 = vmatpush.bf16.msra.mxu3 %v772_v33 }
  0x36   :  { %211 = vmatmul.bf16.vlgmr.msra.gmra.mxu0 %v745_v48 }
  0x37   :  { %225 = vmatmul.bf16.vlgmr.msra.gmra.mxu1 %v745_v48 }
  0x39   :  { %559 = vmatpush.bf16.msra.mxu3 %v771_v53 }
  0xb3   :  { %v212_v52 = vpop.f32.mrf.mxu0 }
  0xb4   :  { %v990_v55 = vadd.f32 %v212_v52, %v113_v50  ;;  %v226_v56 = vpop.f32.mrf.mxu1  ;;  %v763_v52 = vld [vmem:[#allocation8 + $0x8] sm:$0xff] }
  0xb5   :  { %v992_v57 = vadd.f32 %v226_v56, %v114_v51  ;;  %545 = vmatpush.bf16.msra.mxu2 %v763_v52 }
  0xb6   :  { %v995_v58 = vmul.f32 0.70710677, %v990_v55 }
  0xb7   :  { %v998_v59 = vmul.f32 0.70710677, %v992_v57 }
  0xb8   :  { %v239_v62 = vmul.f32 %v995_v58, %v995_v58 }
  0xb9   :  { %v279_v63 = vmul.f32 %v998_v59, %v998_v59  ;;  %546 = vmatpush.bf16.msra.mxu2 %v762_v9 }
  0xba   :  { %v1004_v2 = vmin.f32 %v239_v62, 16.0 }
  0xbb   :  { %v1006_v3 = vmin.f32 %v279_v63, 16.0  ;;  %v214_v4 = vpop.f32.mrf.mxu0 }
  0xbc   :  { %v241_v5 = vmul.f32 2.1237322e-06, %v1004_v2  ;;  %v1009_v6 = vadd.f32 %v214_v4, %v113_v50  ;;  %v228_v7 = vpop.f32.mrf.mxu1  ;;  %v252_v12 = vmul.f32 3.8918573e-05, %v1004_v2 }
  0xbd   :  { %v281_v10 = vmul.f32 2.1237322e-06, %v1006_v3  ;;  %v1012_v11 = vadd.f32 %v228_v7, %v114_v51  ;;  %v292_v13 = vmul.f32 3.8918573e-05, %v1006_v3 }
  0xbe   :  { %v242_v14 = vadd.f32 0.00028619796, %v241_v5  ;;  %v1017_v15 = vmul.f32 0.70710677, %v1009_v6  ;;  %v253_v20 = vadd.f32 0.001143296, %v252_v12 }
  0xbf   :  { %v282_v16 = vadd.f32 0.00028619796, %v281_v10  ;;  %v1020_v17 = vmul.f32 0.70710677, %v1012_v11  ;;  %v293_v21 = vadd.f32 0.001143296, %v292_v13 }
  0xc0   :  { %v243_v18 = vmul.f32 %v242_v14, %v1004_v2  ;;  %v319_v19 = vmul.f32 %v1017_v15, %v1017_v15  ;;  %v254_v28 = vmul.f32 %v253_v20, %v1004_v2  ;;  %v770_v10 = vld [vmem:[#allocation8 + $0x40] sm:$0xff] }
  0xc1   :  { %v283_v22 = vmul.f32 %v282_v16, %v1006_v3  ;;  %v359_v23 = vmul.f32 %v1020_v17, %v1020_v17  ;;  %v294_v29 = vmul.f32 %v293_v21, %v1006_v3  ;;  %560 = vmatpush.bf16.msra.mxu3 %v770_v10 }
  0xc2   :  { %v244_v26 = vadd.f32 0.0036580483, %v243_v18  ;;  %v1028_v27 = vmin.f32 %v319_v19, 16.0  ;;  %v255_v35 = vadd.f32 0.014752088, %v254_v28 }
  0xc3   :  { %v284_v30 = vadd.f32 0.0036580483, %v283_v22  ;;  %v1032_v31 = vmin.f32 %v359_v23, 16.0  ;;  %v295_v38 = vadd.f32 0.014752088, %v294_v29 }
  0xc4   :  { %v321_v34 = vmul.f32 2.1237322e-06, %v1028_v27  ;;  %v332_v36 = vmul.f32 3.8918573e-05, %v1028_v27  ;;  %v245_v40 = vmul.f32 %v244_v26, %v1004_v2  ;;  %v256_v42 = vmul.f32 %v255_v35, %v1004_v2 }
  0xc5   :  { %v361_v37 = vmul.f32 2.1237322e-06, %v1032_v31  ;;  %v372_v39 = vmul.f32 3.8918573e-05, %v1032_v31  ;;  %v296_v45 = vmul.f32 %v295_v38, %v1006_v3  ;;  %v285_v50 = vmul.f32 %v284_v30, %v1006_v3 }
  0xc6   :  { %v322_v41 = vadd.f32 0.00028619796, %v321_v34  ;;  %v333_v43 = vadd.f32 0.001143296, %v332_v36  ;;  %v257_v48 = vadd.f32 0.112945676, %v256_v42 }
  0xc7   :  { %v362_v44 = vadd.f32 0.00028619796, %v361_v37  ;;  %v373_v46 = vadd.f32 0.001143296, %v372_v39  ;;  %v297_v54 = vadd.f32 0.112945676, %v296_v45 }
  0xc8   :  { %v323_v47 = vmul.f32 %v322_v41, %v1028_v27  ;;  %v334_v49 = vmul.f32 %v333_v43, %v1028_v27  ;;  %v246_v60 = vadd.f32 0.05243302, %v245_v40  ;;  %v258_v62 = vmul.f32 %v257_v48, %v1004_v2 }
  0xc9   :  { %v363_v51 = vmul.f32 %v362_v44, %v1032_v31  ;;  %v374_v56 = vmul.f32 %v373_v46, %v1032_v31  ;;  %v298_v0 = vmul.f32 %v297_v54, %v1006_v3  ;;  %v286_v16 = vadd.f32 0.05243302, %v285_v50 }
  0xca   :  { %v324_v61 = vadd.f32 0.0036580483, %v323_v47  ;;  %v335_v63 = vadd.f32 0.014752088, %v334_v49  ;;  %v259_v7 = vadd.f32 0.4994258, %v258_v62  ;;  %v247_v14 = vmul.f32 %v246_v60, %v1004_v2 }
  0xcb   :  { %v375_v1 = vadd.f32 0.014752088, %v374_v56  ;;  %v364_v5 = vadd.f32 0.0036580483, %v363_v51  ;;  %v299_v12 = vadd.f32 0.4994258, %v298_v0  ;;  %v287_v29 = vmul.f32 %v286_v16, %v1006_v3 }
  0xcc   :  { %v325_v4 = vmul.f32 %v324_v61, %v1028_v27  ;;  %v336_v8 = vmul.f32 %v335_v63, %v1028_v27  ;;  %v260_v18 = vmul.f32 %v259_v7, %v1004_v2  ;;  %v248_v28 = vadd.f32 0.18741608, %v247_v14 }
  0xcd   :  { %v376_v13 = vmul.f32 %v375_v1, %v1032_v31  ;;  %v300_v20 = vmul.f32 %v299_v12, %v1006_v3  ;;  %v365_v23 = vmul.f32 %v364_v5, %v1032_v31  ;;  %v288_v37 = vadd.f32 0.18741608, %v287_v29 }
  0xce   :  { %v337_v19 = vadd.f32 0.112945676, %v336_v8  ;;  %v326_v22 = vadd.f32 0.05243302, %v325_v4  ;;  %v261_v24 = vadd.f32 1.0, %v260_v18  ;;  %v249_v36 = vmul.f32 %v248_v28, %v1004_v2 }
  0xcf   :  { %v377_v21 = vadd.f32 0.112945676, %v376_v13  ;;  %v301_v26 = vadd.f32 1.0, %v300_v20  ;;  %v366_v34 = vadd.f32 0.05243302, %v365_v23  ;;  %v289_v47 = vmul.f32 %v288_v37, %v1006_v3 }
  0xd0   :  { %v338_v25 = vmul.f32 %v337_v19, %v1028_v27  ;;  %789 = vrcp.f32 %v261_v24  ;;  %v327_v33 = vmul.f32 %v326_v22, %v1028_v27  ;;  %v250_v46 = vadd.f32 1.1283791, %v249_v36 }
  0xd1   :  { %v378_v30 = vmul.f32 %v377_v21, %v1032_v31  ;;  %791 = vrcp.f32 %v301_v26  ;;  %v367_v42 = vmul.f32 %v366_v34, %v1032_v31  ;;  %v271_v50 = vand.u32 2147483647, %v261_v24 }
  0xd2   :  { %v339_v32 = vadd.f32 0.4994258, %v338_v25  ;;  %v328_v41 = vadd.f32 0.18741608, %v327_v33  ;;  %v273_v53 = vand.u32 2147483648, %v261_v24  ;;  %v313_v60 = vand.u32 2147483648, %v301_v26 }
  0xd3   :  { %v379_v38 = vadd.f32 0.4994258, %v378_v30  ;;  %v368_v52 = vadd.f32 0.18741608, %v367_v42  ;;  %v251_v61 = vmul.f32 %v250_v46, %v995_v58  ;;  %v290_v62 = vadd.f32 1.1283791, %v289_v47 }
  0xd4   :  { %v340_v35 = vmul.f32 %v339_v32, %v1028_v27  ;;  %v329_v2 = vmul.f32 %v328_v41, %v1028_v27  ;;  %vm267_vm2 = vweird.f32 %v261_v24  ;;  %vm272_vm3 = vcmp.eq.f32.partialorder %v271_v50, 8.507059e+37 }
  0xd5   :  { %v380_v43 = vmul.f32 %v379_v38, %v1032_v31  ;;  %v311_v1 = vand.u32 2147483647, %v301_v26  ;;  %v274_v27 = vor.u32 1.1754944e-38, %v273_v53  ;;  %vm307_vm5 = vweird.f32 %v301_v26 }
  0xd6   :  { %v341_v39 = vadd.f32 1.0, %v340_v35  ;;  %v790_v40 = vpop.eup %789  ;;  %v330_v7 = vadd.f32 1.1283791, %v329_v2  ;;  %v369_v8 = vmul.f32 %v368_v52, %v1032_v31  ;;  %v314_v10 = vor.u32 1.1754944e-38, %v313_v60 }
  0xd7   :  { %v792_v44 = vpop.eup %791  ;;  %v263_v45 = vmul.f32 %v790_v40, %v261_v24  ;;  %v1064_v51 = vadd.f32 1.0, %v380_v43  ;;  %vm268_vm0 = vweird.f32 %v790_v40  ;;  %vm312_vm8 = vcmp.eq.f32.partialorder %v311_v1, 8.507059e+37 }
  0xd8   :  { %793 = vrcp.f32 %v341_v39  ;;  %v303_v48 = vmul.f32 %v792_v44, %v301_v26  ;;  %vm308_vm1 = vweird.f32 %v792_v44  ;;  %vm269_vm4 = vmor %vm267_vm2, %vm268_vm0  ;;  %v351_v13 = vand.u32 2147483647, %v341_v39 }
  0xd9   :  { %v264_v49 = vsub.f32 1.0, %v263_v45  ;;  %795 = vrcp.f32 %v1064_v51  ;;  %vm309_vm6 = vmor %vm307_vm5, %vm308_vm1  ;;  %v353_v18 = vand.u32 2147483648, %v341_v39  ;;  %v291_v23 = vmul.f32 %v290_v62, %v998_v59  ;;  %v788_v62 = vld [vmem:[%s1095_s5] ss:$0 sm:$0xff] }
  0xda   :  { %v304_v54 = vsub.f32 1.0, %v303_v48  ;;  %v331_v31 = vmul.f32 %v330_v7, %v1017_v15  ;;  %v370_v24 = vadd.f32 1.1283791, %v369_v8  ;;  %vm347_vm9 = vweird.f32 %v341_v39 }
  0xdb   :  { %v265_v56 = vmul.f32 %v790_v40, %v264_v49  ;;  %vm352_vm10 = vcmp.eq.f32.partialorder %v351_v13, 8.507059e+37  ;;  %v354_v28 = vor.u32 1.1754944e-38, %v353_v18  ;;  %v391_v30 = vand.u32 2147483647, %v1064_v51 }
  0xdc   :  { %v305_v63 = vmul.f32 %v792_v44, %v304_v54  ;;  %v393_v32 = vand.u32 2147483648, %v1064_v51  ;;  %vm387_vm13 = vweird.f32 %v1064_v51  ;;  %v371_v15 = vmul.f32 %v370_v24, %v1020_v17 }
  0xdd   :  { %v266_v0 = vadd.f32 %v790_v40, %v265_v56  ;;  %vm392_vm15 = vcmp.eq.f32.partialorder %v391_v30, 8.507059e+37  ;;  %v233_v45 = vmul.f32 0.5, %v1009_v6  ;;  %v232_v17 = vmul.f32 0.5, %v992_v57 }
  0xde   :  { %v794_v3 = vpop.eup %793  ;;  %v306_v5 = vadd.f32 %v792_v44, %v305_v63  ;;  %v394_v38 = vor.u32 1.1754944e-38, %v393_v32  ;;  %v234_v2 = vmul.f32 0.5, %v1012_v11  ;;  %v582_v63 = vld [vmem:[#allocation5] sm:$0xff] }
  0xdf   :  { %v343_v4 = vmul.f32 %v794_v3, %v341_v39  ;;  %v270_v9 = vsel %vm269_vm4, %v790_v40, %v266_v0  ;;  %v796_v16 = vpop.eup %795  ;;  %vm348_vm7 = vweird.f32 %v794_v3 }
  0xe0   :  { %v275_v58 = vsel %vm272_vm3, %v274_v27, %v270_v9  ;;  %v310_v14 = vsel %vm309_vm6, %v792_v44, %v306_v5  ;;  %v383_v22 = vmul.f32 %v796_v16, %v1064_v51  ;;  %vm349_vm11 = vmor %vm347_vm9, %vm348_vm7  ;;  %vm388_vm12 = vweird.f32 %v796_v16  ;;  %v583_v27 = vld [vmem:[#allocation5 + $0x8] sm:$0xff] }
  0xe1   :  { %v344_v12 = vsub.f32 1.0, %v343_v4  ;;  %v276_v19 = vmul.f32 %v275_v58, %v251_v61  ;;  %v315_v21 = vsel %vm312_vm8, %v314_v10, %v310_v14  ;;  %vm389_vm14 = vmor %vm387_vm13, %vm388_vm12  ;;  %v231_v44 = vmul.f32 0.5, %v990_v55 }
  0xe2   :  { %v384_v26 = vsub.f32 1.0, %v383_v22  ;;  %v316_v29 = vmul.f32 %v315_v21, %v291_v23 }
  0xe3   :  { %v345_v20 = vmul.f32 %v794_v3, %v344_v12  ;;  %v677_v33 = vclamps-f32 %v276_v19, 1.0 }
  0xe4   :  { %v385_v35 = vmul.f32 %v796_v16, %v384_v26  ;;  %v678_v41 = vclamps-f32 %v316_v29, 1.0 }
  0xe5   :  { %v346_v25 = vadd.f32 %v794_v3, %v345_v20  ;;  %v399_v40 = vadd.f32 1.0, %v677_v33 }
  0xe6   :  { %v386_v37 = vadd.f32 %v796_v16, %v385_v35  ;;  %v400_v51 = vadd.f32 1.0, %v678_v41 }
  0xe7   :  { %v350_v34 = vsel %vm349_vm11, %v794_v3, %v346_v25  ;;  %v403_v48 = vmul.f32 %v399_v40, %v231_v44 }
  0xe8   :  { %v355_v36 = vsel %vm352_vm10, %v354_v28, %v350_v34  ;;  %v390_v42 = vsel %vm389_vm14, %v796_v16, %v386_v37  ;;  %v404_v54 = vmul.f32 %v400_v51, %v232_v17 }
  0xe9   :  { %v356_v59 = vmul.f32 %v355_v36, %v331_v31  ;;  %v395_v43 = vsel %vm392_vm15, %v394_v38, %v390_v42 }
  0xea   :  { %v396_v47 = vmul.f32 %v395_v43, %v371_v15 }
  0xeb   :  { %v679_v39 = vclamps-f32 %v356_v59, 1.0 }
  0xec   :  { %v680_v50 = vclamps-f32 %v396_v47, 1.0 }
  0xed   :  { %v401_v46 = vadd.f32 1.0, %v679_v39 }
  0xee   :  { %v402_v53 = vadd.f32 1.0, %v680_v50 }
  0xef   :  { %v405_v49 = vmul.f32 %v401_v46, %v233_v45 }
  0xf0   :  { %v406_v56 = vmul.f32 %v402_v53, %v234_v2 }
  0xf1   :  { %v409_v52 = vpack.c.bf16 %v405_v49, %v403_v48 }
  0xf2   :  { %v410_v60 = vpack.c.bf16 %v406_v56, %v404_v54 }
  0xf3   :  { %547 = vmatmul.bf16.vlgmr.msra.gmra.mxu2 %v409_v52 }
  0xf4   :  { %561 = vmatmul.bf16.vlgmr.msra.gmra.mxu3 %v410_v60 }
 0x176   :  { %v548_v55 = vpop.f32.mrf.mxu2 }
 0x177   :  { %v562_v61 = vpop.f32.mrf.mxu3 }
 0x178   :  { %v563_v6 = vadd.f32 %v562_v61, %v548_v55 }
 0x17a   :  { %v580_v3 = vadd.f32 %v788_v62, %v563_v6 }
 0x17c   :  { %v584_v57 = vadd.f32 %v582_v63, %v580_v3 }
 0x17e   :  { %v550_v0 = vpop.f32.mrf.mxu2  ;;  %586 = vst [vmem:[#allocation10] sm:$0xff] %v584_v57 }
 0x17f   :  { %v564_v1 = vpop.f32.mrf.mxu3 }
 0x180   :  { %v565_v11 = vadd.f32 %v564_v1, %v550_v0 }
 0x182   :  { %v581_v4 = vadd.f32 %v788_v62, %v565_v11 }
 0x184   :  { %v585_v5 = vadd.f32 %v583_v27, %v581_v4 }
 0x186   :  { %587 = vst [vmem:[#allocation10 + $0x8] sm:$0xff] %v585_v5 }
 0x187   :  { %600 = dma.vmem_to_hbm [thread:$0]  %s593_s21, 256, %s595_s24, [#allocation4], %s926_s29, %s926_s29, %s927_s30  }
 0x188   :  { %923 = dma.done.wait [#allocation4], 256  }
 0x189   :  { %924 = vsyncadd [#allocation4], 4294967040 }
 0x18a   :  { %605 = vsyncpa [#allocation3], 1 }
 0x18b   :  { %606 = vsyncpa [#allocation6], 1 }
 0x18c   :  { %607 = vsyncpa [#allocation9], 1 }
 0x18d   :  { %608 = vsyncpa [#allocation4], 1 }

</bundles_post_ra>
